<compile_context>
chip_gen: v5e
topology: v5e:2x2
jax: 0.10.0
libtpu: 0.0.40
codegen_flags: <defaults>
</compile_context>

<pallas_src>
import jax
import jax.numpy as jnp
from jax.experimental import pallas as pl
from jax.experimental.pallas import tpu as pltpu


def _round_up(n, m):
    return ((n + m - 1) // m) * m


def _pad2d(a, rows, cols):
    pr, pc = rows - a.shape[0], cols - a.shape[1]
    if pr == 0 and pc == 0:
        return a
    return jnp.pad(a, ((0, pr), (0, pc)))


def _vmem_capacity_bytes():
    # Hardware query only; a failure just picks the most conservative (v7x) size.
    try:
        cap = getattr(pltpu.get_tpu_info(), "vmem_capacity_bytes", None)
        if cap:
            return int(cap)
    except Exception:  # query failure only selects conservative defaults
        pass
    return 64 * 1024 * 1024


# ---------------------------------------------------------------------------
# Kernels
# ---------------------------------------------------------------------------

def ffn_kernel_resident(x_ref, w1_ref, b1_ref, w2_ref, b2_ref, o_ref):
    """Single d_ff chunk: weights resident in VMEM, no accumulator scratch."""
    x = x_ref[...].astype(w1_ref.dtype)
    h = jnp.dot(x, w1_ref[...], preferred_element_type=jnp.float32)
    h = jnp.maximum(h + b1_ref[...], 0.0)
    # --- dropout: inference mode = identity ---
    y = jnp.dot(h.astype(w2_ref.dtype), w2_ref[...],
                preferred_element_type=jnp.float32)
    o_ref[...] = (y + b2_ref[...]).astype(o_ref.dtype)


def ffn_kernel_chunked(x_ref, w1_ref, b1_ref, w2_ref, b2_ref, o_ref, acc_ref):
    """d_ff split into chunks. The d_ff axis MUST stay the last grid axis with
    'arbitrary' semantics: acc_ref carries the partial second-matmul sum."""
    f = pl.program_id(1)

    @pl.when(f == 0)
    def _init():
        acc_ref[...] = jnp.zeros_like(acc_ref)

    # --- first Linear + ReLU (weight-dtype operands on the MXU, f32 acc) ---
    x = x_ref[...].astype(w1_ref.dtype)
    h = jnp.dot(x, w1_ref[...], preferred_element_type=jnp.float32)
    h = jnp.maximum(h + b1_ref[...], 0.0)

    # --- dropout: inference mode = identity ---

    # --- second Linear: accumulate partial products over d_ff chunks ---
    acc_ref[...] += jnp.dot(h.astype(w2_ref.dtype), w2_ref[...],
                            preferred_element_type=jnp.float32)

    @pl.when(f == pl.num_programs(1) - 1)
    def _finalize():
        o_ref[...] = (acc_ref[...] + b2_ref[...]).astype(o_ref.dtype)


# ---------------------------------------------------------------------------
# Parameter preparation (run once, outside the forward pass)
# ---------------------------------------------------------------------------

def prepare_ffn_params(w1, b1, w2, b2):
    """Pad / cast / reshape parameters ONCE at setup time (not per call)."""
    d_model, d_ff = w1.shape
    assert w2.shape == (d_ff, d_model)
    assert b1.shape == (d_ff,) and b2.shape == (d_model,)
    dp = _round_up(d_model, 128)   # lane-dense feature dims
    fp = _round_up(d_ff, 128)
    return {
        "w1": _pad2d(jnp.asarray(w1), dp, fp),
        "b1": _pad2d(jnp.asarray(b1, jnp.float32).reshape(1, d_ff), 1, fp),
        "w2": _pad2d(jnp.asarray(w2), fp, dp),
        "b2": _pad2d(jnp.asarray(b2, jnp.float32).reshape(1, d_model), 1, dp),
        "d_model": d_model, "d_ff": d_ff, "dp": dp, "fp": fp,
    }


# ---------------------------------------------------------------------------
# Forward
# ---------------------------------------------------------------------------

def positionwise_feed_forward(x, params, *, tile_rows=None, tile_ff=None,
                              vmem_limit_bytes=None):
    """x: [..., d_model]; params: output of prepare_ffn_params()."""
    d_model, d_ff = params["d_model"], params["d_ff"]
    dp, fp = params["dp"], params["fp"]
    w1_p, b1_p, w2_p, b2_p = params["w1"], params["b1"], params["w2"], params["b2"]
    assert x.shape[-1] == d_model

    # --- generation-aware defaults -------------------------------------------
    vmem_cap = _vmem_capacity_bytes()
    big_vmem = vmem_cap >= 96 * 1024 * 1024              # v5e/v6e (128 MiB) vs v7x (64 MiB)
    if vmem_limit_bytes is None:
        vmem_limit_bytes = min(vmem_cap * 3 // 4, 100 * 1024 * 1024)
    if tile_rows is None:
        tile_rows = 1024 if big_vmem else 512            # AI ~ tile_rows flops / weight byte
    if tile_ff is None:
        tile_ff = 512 if big_vmem else 256

    orig_shape = x.shape
    w_dtype = w1_p.dtype
    out_dtype = x.dtype
    # bf16 activation I/O halves x-tile HBM reads; matmuls already run in w_dtype.
    x_io_dtype = (w_dtype if jnp.dtype(w_dtype).itemsize < jnp.dtype(x.dtype).itemsize
                  else x.dtype)
    x2d = x.reshape(-1, d_model).astype(x_io_dtype)
    n_rows = x2d.shape[0]

    w_bytes = jnp.dtype(w_dtype).itemsize
    x_bytes = jnp.dtype(x_io_dtype).itemsize
    o_bytes = jnp.dtype(out_dtype).itemsize

    # --- row tiling -----------------------------------------------------------
    tm = min(tile_rows, _round_up(n_rows, 8))
    # Keep >= 2 row tiles so the 'parallel' axis can feed both v7x TensorCores.
    if _round_up(n_rows, tm) // tm < 2 and tm > 8:
        tm = max(8, _round_up(tm // 2, 8))

    budget = vmem_limit_bytes

    def _resident_bytes(tm_):
        # single-buffered weights + double-buffered x/out tiles + f32 h temp
        return int(1.15 * (2 * dp * fp * w_bytes + (fp + dp) * 4
                           + 2 * tm_ * dp * x_bytes + 2 * tm_ * dp * o_bytes
                           + tm_ * fp * 4))

    def _chunked_bytes(tm_, tf_):
        # all operands double-buffered + f32 accumulator + f32 h temp
        return int(1.15 * (2 * tm_ * dp * x_bytes + 2 * dp * tf_ * w_bytes
                           + 2 * tf_ * 4 + 2 * tf_ * dp * w_bytes + 2 * dp * 4
                           + 2 * tm_ * dp * o_bytes + tm_ * dp * 4 + tm_ * tf_ * 4))

    weights_resident = _resident_bytes(tm) <= budget

    if weights_resident:
        tf = fp
    else:
        # Largest multiple of 128 that divides fp and is <= tile_ff, so the
        # weights padded once in prepare_ffn_params never need re-padding here.
        tf = 128
        for d in range(1, fp // 128 + 1):
            if (fp // 128) % d == 0 and d * 128 <= min(tile_ff, fp):
                tf = d * 128
        while tm > 8 and _chunked_bytes(tm, tf) > budget:
            tm = max(8, _round_up(tm // 2, 8))

    n_ff_tiles = fp // tf
    rows_p = _round_up(n_rows, tm)
    n_row_tiles = rows_p // tm

    # Zero-pad rows (padded rows produce exact zeros and are sliced off).
    x_p = _pad2d(x2d, rows_p, dp)

    flops = 4 * rows_p * dp * fp                          # two matmuls
    weight_bytes = 2 * dp * fp * w_bytes + (fp + dp) * 4
    bytes_accessed = (rows_p * dp * (x_bytes + o_bytes)
                      + weight_bytes * (1 if n_ff_tiles == 1 else n_row_tiles))
    cost = pl.CostEstimate(flops=flops, transcendentals=0,
                           bytes_accessed=bytes_accessed)

    def run(single_buffer_invariants):
        def inv_spec(shape, index_map):
            # Grid-invariant operand: single-buffered, DMA'd from HBM once per call.
            if single_buffer_invariants:
                return pl.BlockSpec(shape, index_map, pipeline_mode=pl.Buffered(1))
            return pl.BlockSpec(shape, index_map)

        if n_ff_tiles == 1:
            # Weights-resident fast path: no accumulator scratch, direct write.
            kernel = ffn_kernel_resident
            grid = (n_row_tiles,)
            in_specs = [
                pl.BlockSpec((tm, dp), lambda i: (i, 0)),      # x rows
                inv_spec((dp, fp), lambda i: (0, 0)),          # W1 (resident)
                inv_spec((1, fp), lambda i: (0, 0)),           # b1
                inv_spec((fp, dp), lambda i: (0, 0)),          # W2 (resident)
                inv_spec((1, dp), lambda i: (0, 0)),           # b2
            ]
            out_specs = pl.BlockSpec((tm, dp), lambda i: (i, 0))
            scratch_shapes = []
            dim_sem = ("parallel",)
        else:
            kernel = ffn_kernel_chunked
            grid = (n_row_tiles, n_ff_tiles)
            in_specs = [
                pl.BlockSpec((tm, dp), lambda i, f: (i, 0)),   # x rows
                pl.BlockSpec((dp, tf), lambda i, f: (0, f)),   # W1 column block
                pl.BlockSpec((1, tf), lambda i, f: (0, f)),    # b1 chunk
                pl.BlockSpec((tf, dp), lambda i, f: (f, 0)),   # W2 row block
                inv_spec((1, dp), lambda i, f: (0, 0)),        # b2 (grid-invariant)
            ]
            out_specs = pl.BlockSpec((tm, dp), lambda i, f: (i, 0))
            scratch_shapes = [pltpu.VMEM((tm, dp), jnp.float32)]
            # d_ff reduction axis stays LAST and 'arbitrary' (accumulator depends on it).
            dim_sem = ("parallel", "arbitrary")

        grid_spec = pltpu.PrefetchScalarGridSpec(
            num_scalar_prefetch=0,
            grid=grid,
            in_specs=in_specs,
            out_specs=out_specs,
            scratch_shapes=scratch_shapes,
        )
        return pl.pallas_call(
            kernel,
            out_shape=jax.ShapeDtypeStruct((rows_p, dp), out_dtype),
            grid_spec=grid_spec,
            cost_estimate=cost,
            compiler_params=pltpu.CompilerParams(
                dimension_semantics=dim_sem,
                vmem_limit_bytes=vmem_limit_bytes,
            ),
        )(x_p, w1_p, b1_p, w2_p, b2_p)

    # Narrow fallback: only builds whose BlockSpec / lowering rejects
    # pipeline_mode=pl.Buffered(1) retry with default buffering.
    # Genuine compile / VMEM errors (RuntimeError / XlaRuntimeError) propagate.
    try:
        out2d = run(single_buffer_invariants=True)
    except (TypeError, ValueError, NotImplementedError, pltpu.LoweringException):
        out2d = run(single_buffer_invariants=False)

    if rows_p != n_rows or dp != d_model:
        out2d = out2d[:n_rows, :d_model]
    return out2d.reshape(orig_shape)


def reference(x, w1, b1, w2, b2):
    # Mirrors the kernel's dtype strategy: matmul operands in the weight dtype,
    # accumulation / bias / ReLU in f32.
    xf = x.astype(w1.dtype).astype(jnp.float32)
    h = jnp.maximum(xf @ w1.astype(jnp.float32) + b1.astype(jnp.float32), 0.0)
    hf = h.astype(w2.dtype).astype(jnp.float32)
    y = hf @ w2.astype(jnp.float32) + b2.astype(jnp.float32)
    return y.astype(x.dtype)


if __name__ == "__main__":
    B, S, d_model, d_ff = 2, 8, 32, 64  # small demo shapes

    key = jax.random.PRNGKey(0)
    kx, kw1, kb1, kw2, kb2 = jax.random.split(key, 5)

    x = jax.random.normal(kx, (B, S, d_model), dtype=jnp.float32)

    # Weights in bf16 for the fast MXU path (accumulation stays f32 in-kernel).
    w1 = (jax.random.normal(kw1, (d_model, d_ff), dtype=jnp.float32)
          / jnp.sqrt(d_model)).astype(jnp.bfloat16)
    b1 = jax.random.normal(kb1, (d_ff,), dtype=jnp.float32) * 0.01
    w2 = (jax.random.normal(kw2, (d_ff, d_model), dtype=jnp.float32)
          / jnp.sqrt(d_ff)).astype(jnp.bfloat16)
    b2 = jax.random.normal(kb2, (d_model,), dtype=jnp.float32) * 0.01

    params = prepare_ffn_params(w1, b1, w2, b2)   # pad / cast once at setup
    out = positionwise_feed_forward(x, params)
    out = jax.block_until_ready(out)

    ref = reference(x, w1, b1, w2, b2)
    assert out.shape == (B, S, d_model)
    assert jnp.allclose(out, ref, atol=2e-2, rtol=2e-2), "mismatch vs reference"

    print("KERNEL_OK")
</pallas_src>

<mosaic_0001>
module attributes {stable_mosaic.version = 11 : i64} {
  func.func @ffn_kernel_resident(%arg0: i32, %arg1: memref<8x128xbf16, #tpu.memory_space<vmem>>, %arg2: memref<128x128xbf16, #tpu.memory_space<vmem>>, %arg3: memref<1x128xf32, #tpu.memory_space<vmem>>, %arg4: memref<128x128xbf16, #tpu.memory_space<vmem>>, %arg5: memref<1x128xf32, #tpu.memory_space<vmem>>, %arg6: memref<8x128xf32, #tpu.memory_space<vmem>>) attributes {dimension_semantics = [#tpu.dimension_semantics<parallel>], iteration_bounds = array<i64: 2>, scalar_prefetch = 0 : i64, scratch_operands = 0 : i64, tpu.core_type = #tpu.core_type<tc>, window_params = [{transform_indices = @transform_0, window_bounds = array<i64: 8, 128>}, {pipeline_mode = #tpu.pipeline_mode<synchronous>, transform_indices = @transform_1, window_bounds = array<i64: 128, 128>}, {pipeline_mode = #tpu.pipeline_mode<synchronous>, transform_indices = @transform_2, window_bounds = array<i64: 1, 128>}, {pipeline_mode = #tpu.pipeline_mode<synchronous>, transform_indices = @transform_3, window_bounds = array<i64: 128, 128>}, {pipeline_mode = #tpu.pipeline_mode<synchronous>, transform_indices = @transform_4, window_bounds = array<i64: 1, 128>}, {transform_indices = @transform_5, window_bounds = array<i64: 8, 128>}]} {
    %c0 = arith.constant 0 : index
    %c0_0 = arith.constant 0 : index
    %0 = vector.load %arg1[%c0, %c0_0] : memref<8x128xbf16, #tpu.memory_space<vmem>>, vector<8x128xbf16>
    %c0_1 = arith.constant 0 : index
    %c0_2 = arith.constant 0 : index
    %1 = vector.load %arg2[%c0_1, %c0_2] : memref<128x128xbf16, #tpu.memory_space<vmem>>, vector<128x128xbf16>
    %cst = arith.constant dense<0.000000e+00> : vector<8x128xf32>
    %2 = tpu.matmul %0, %1, %cst {dimension_numbers = #tpu.dot_dimension_numbers<[1], [0], [0], [1], [0, 0, 1, 1], [], []>} : vector<8x128xbf16>, vector<128x128xbf16>, vector<8x128xf32> -> vector<8x128xf32>
    %c0_3 = arith.constant 0 : index
    %c0_4 = arith.constant 0 : index
    %3 = vector.load %arg3[%c0_3, %c0_4] : memref<1x128xf32, #tpu.memory_space<vmem>>, vector<1x128xf32>
    %4 = vector.broadcast %3 : vector<1x128xf32> to vector<8x128xf32>
    %5 = arith.addf %2, %4 : vector<8x128xf32>
    %cst_5 = arith.constant 0.000000e+00 : f32
    %6 = vector.broadcast %cst_5 : f32 to vector<8x128xf32>
    %7 = arith.maximumf %5, %6 : vector<8x128xf32>
    %8 = arith.truncf %7 : vector<8x128xf32> to vector<8x128xbf16>
    %c0_6 = arith.constant 0 : index
    %c0_7 = arith.constant 0 : index
    %9 = vector.load %arg4[%c0_6, %c0_7] : memref<128x128xbf16, #tpu.memory_space<vmem>>, vector<128x128xbf16>
    %cst_8 = arith.constant dense<0.000000e+00> : vector<8x128xf32>
    %10 = tpu.matmul %8, %9, %cst_8 {dimension_numbers = #tpu.dot_dimension_numbers<[1], [0], [0], [1], [0, 0, 1, 1], [], []>} : vector<8x128xbf16>, vector<128x128xbf16>, vector<8x128xf32> -> vector<8x128xf32>
    %c0_9 = arith.constant 0 : index
    %c0_10 = arith.constant 0 : index
    %11 = vector.load %arg5[%c0_9, %c0_10] : memref<1x128xf32, #tpu.memory_space<vmem>>, vector<1x128xf32>
    %12 = vector.broadcast %11 : vector<1x128xf32> to vector<8x128xf32>
    %13 = arith.addf %10, %12 : vector<8x128xf32>
    %c0_11 = arith.constant 0 : index
    %c0_12 = arith.constant 0 : index
    %14 = vector.load %arg6[%c0_11, %c0_12] : memref<8x128xf32, #tpu.memory_space<vmem>>, vector<8x128xf32>
    tpu.vector_store %arg6[%c0_11, %c0_12], %13 {strides = array<i32>} : memref<8x128xf32, #tpu.memory_space<vmem>>, vector<8x128xf32>,
    return
  }
  func.func @transform_0(%arg0: i32) -> (i32, i32) {
    %c0_i32 = arith.constant 0 : i32
    %c0_i32_0 = arith.constant 0 : i32
    return %arg0, %c0_i32 : i32, i32
  }
  func.func @transform_1(%arg0: i32) -> (i32, i32) {
    %c0_i32 = arith.constant 0 : i32
    %c0_i32_0 = arith.constant 0 : i32
    %c0_i32_1 = arith.constant 0 : i32
    return %c0_i32, %c0_i32_0 : i32, i32
  }
  func.func @transform_2(%arg0: i32) -> (i32, i32) {
    %c0_i32 = arith.constant 0 : i32
    %c0_i32_0 = arith.constant 0 : i32
    %c0_i32_1 = arith.constant 0 : i32
    return %c0_i32, %c0_i32_0 : i32, i32
  }
  func.func @transform_3(%arg0: i32) -> (i32, i32) {
    %c0_i32 = arith.constant 0 : i32
    %c0_i32_0 = arith.constant 0 : i32
    %c0_i32_1 = arith.constant 0 : i32
    return %c0_i32, %c0_i32_0 : i32, i32
  }
  func.func @transform_4(%arg0: i32) -> (i32, i32) {
    %c0_i32 = arith.constant 0 : i32
    %c0_i32_0 = arith.constant 0 : i32
    %c0_i32_1 = arith.constant 0 : i32
    return %c0_i32, %c0_i32_0 : i32, i32
  }
  func.func @transform_5(%arg0: i32) -> (i32, i32) {
    %c0_i32 = arith.constant 0 : i32
    %c0_i32_0 = arith.constant 0 : i32
    return %arg0, %c0_i32 : i32, i32
  }
}

</mosaic_0001>

<bundles_post_ra>
// kernel: tpu_custom_call.1
= control target key start
LH: loop header
LB: loop body
LE: loop exit
PB: predicated region body
PF: predicated region fallthrough
CT: control target
= control target key end

     0   :  { %10 = vsyncpa [#allocation3], 0  ;;  %s1064_s0 = inlined_call_operand.hbm [shape: bf16[16,128], index: 0, kind: input, shape index: {}]   ;;  %s1065_s1 = inlined_call_operand.hbm [shape: bf16[128,128], index: 1, kind: input, shape index: {}]   ;;  %s1066_s2 = inlined_call_operand.vmem [shape: f32[1,128], index: 2, kind: input, shape index: {}]   ;;  %s1067_s3 = inlined_call_operand.hbm [shape: bf16[128,128], index: 3, kind: input, shape index: {}]   ;;  %s1068_s4 = inlined_call_operand.vmem [shape: f32[1,128], index: 4, kind: input, shape index: {}]   ;;  %s1069_s5 = inlined_call_operand.hbm [shape: f32[16,128], index: 5, kind: output, shape index: {}]  }
   0x1   :  { %12 = vsyncpa [#allocation3 + $0x1], 0 }
   0x2   :  { %13 = vsyncpa [#allocation6], 0 }
   0x3   :  { %14 = vsyncpa [#allocation4], 0 }
   0x4   :  { %16 = vsyncpa [#allocation4 + $0x1], 0  ;;  %s909_s18 = smov 0   ;;  %s911_s19 = smov 0  }
   0x5   :  { %s913_s20 = smov 0   ;;  %s915_s21 = smov 0  }
   0x6 LB: > { %s174_s24 = sshll.u32 %s1065_s1, 4  ;;  %s933_s25 = sadd.s32 4294967295, %s873_s21   ;;  %s873_s21 = sphi %s915_s21, %s1080_s21   ;;  %s869_s20 = sphi %s913_s20, %s1079_s20   ;;  %s865_s19 = sphi %s911_s19, %s1078_s19   ;;  %s861_s18 = sphi %s909_s18, %s1077_s18   ;;  %s175_s24 = int_to_ptr.hbm [resolvable:$true] %s174_s24 }
   0x7   : > { %p547_p0 = scmp.ge.s32.totalorder %s873_s21, 1  ;;  %p43_p1 = scmp.eq.s32.totalorder %s933_s25, 0 }
   0x8   : > { %p163_p2 = scmp.lt.s32.totalorder %s873_s21, 3  ;;  %s875_s27 = smov [#allocation5]  }
   0x9   : > { %s176_s28 = sshll.u32 %s875_s27, 4  ;;  %s191_s6 = sshll.u32 %s1067_s3, 4  ;;  %s177_s28 = int_to_ptr.vmem [resolvable:$true] %s176_s28  ;;  %s192_s6 = int_to_ptr.hbm [resolvable:$true] %s191_s6 }
   0xa   : > { %p938_p3 = pnand %p547_p0, %p163_p2  ;;  %s876_s7 = smov [#allocation7]  }
   0xb   : > { %s193_s8 = sshll.u32 %s876_s7, 4  ;;  %s877_s9 = smov 64   ;;  %s194_s8 = int_to_ptr.vmem [resolvable:$true] %s193_s8 }
   0xc   : > { %p654_p4 = pneg %p938_p3  ;;  %s878_s10 = smov 4  }
   0xd   : > { %s546_s11 = sadd.s32 4294967294, %s873_s21   ;;  %s952_s12 = sadd.s32 1, %s873_s21  }
   0xe   : > { %p655_p6 = pnand %p654_p4, %p43_p1  ;;  %s26_s13 = ssub.s32 %s873_s21, %s952_s12 }
   0xf   : > { %s29_s14 = sadd.s32 1, %s869_s20  ;;  %p27_p7 = scmp.eq.s32.totalorder %s26_s13, 0 }
  0x10   : > { %657 = dma.hbm_to_vmem [thread:$0]  (!%p655_p6), %s175_s24, 1024, %s177_s28, [#allocation6], %s877_s9, %s877_s9, %s878_s10  }
  0x11   : > { %660 = dma.hbm_to_vmem [thread:$0]  (!%p655_p6), %s192_s6, 1024, %s194_s8, [#allocation6], %s877_s9, %s877_s9, %s878_s10  }
  0x12   : > { %p36_p8 = scmp.ne.s32.totalorder %s869_s20, %s865_s19  ;;  %p37_p9 = scmp.eq.s32.totalorder %s873_s21, 0 }
  0x13   : > { %p42_p10 = scmp.ne.s32.totalorder %s865_s19, %s861_s18  ;;  %p150_p13 = scmp.eq.s32.totalorder %s933_s25, 1 }
  0x14   : > { %s963_s15 = scalar_select %p27_p7, %s869_s20, %s29_s14  }
  0x15   : > { %p965_p11 = por %p37_p9, %p36_p8  ;;  %p971_p12 = por %p43_p1, %p42_p10 }
  0x16   : > { %p156_p0 = scmp.eq.s32.totalorder %s546_s11, 1  ;;  %p671_p2 = scmp.lt.s32.totalorder %s873_s21, 2 }
  0x17   : > { %s210_s22 = sand.u32 1, %s869_s20   ;;  %p978_p4 = por %p150_p13, %p36_p8 }
  0x18   : > { %p982_p6 = por %p156_p0, %p42_p10  ;;  %s551_s27 = sshll.u32 %s210_s22, 2 }
  0x19   : > { %s552_s28 = sshll.u32 %s873_s21, 2  ;;  %s214_s7 = scalar_lea.vmem [#allocation2], %s551_s27 }
  0x1a   : > { %s218_s6 = scalar_lea.hbm %s1064_s0, %s552_s28  ;;  %s222_s8 = sshll.u32 %s214_s7, 4  ;;  %s223_s8 = int_to_ptr.vmem [resolvable:$true] %s222_s8 }
  0x1b   : > { %s220_s9 = sshll.u32 %s218_s6, 4  ;;  %p992_p7 = pnand %p671_p2, %p965_p11  ;;  %s221_s9 = int_to_ptr.hbm [resolvable:$true] %s220_s9 }
  0x1c   : > { %s211_s11 = scalar_lea.sflag [#allocation3], %s210_s22  ;;  %s773_s13 = sshra.s32 %s221_s9, 4  ;;  %s774_s13 = int_to_ptr.hbm [resolvable:$true] %s773_s13 }
  0x1d   : > { %s775_s14 = scalar_lea.hbm %s774_s13, 4  ;;  %p777_p9 = pneg %p992_p7 }
  0x1e   : > { %p776_p8 = scmp.ne.s32.totalorder %s774_s13, %s775_s14  ;;  %s780_s29 = scalar_lea.hbm %s1064_s0, 8 }
  0x1f   : > { %p781_p11 = scmp.lt.s32.totalorder %s774_s13, %s1064_s0  ;;  %p782_p0 = scmp.lt.s32.totalorder %s780_s29, %s775_s14 }
  0x20   : > { %p778_p10 = pnand %p777_p9, %p776_p8 }
  0x21   : > { %p783_p2 = por %p782_p0, %p781_p11 }
  0x22   : > { %p779_p13 = pneg %p778_p10 }
  0x24   : > { %p784_p5 = pnand %p783_p2, %p779_p13 }
  0x26   : > { %787 = shalt.err (!%p784_p5)
}
  0x27   : > { %664 = dma.hbm_to_vmem [thread:$0]  (!%p992_p7), %s221_s9, 64, %s223_s8, %s211_s11  }
  0x28   : > { %231 = sbr.rel (%p938_p3) target bundleno = 346 (0x15a), region = 40  ;;  %s1009_s22 = sand.u32 (!%p938_p3), 1, %s865_s19  }
  0x29   : > { %s554_s6 = sshll.u32 (!%p938_p3), %s1009_s22, 2  ;;  %s234_s7 = scalar_lea.sflag (!%p938_p3), [#allocation3], %s1009_s22 }
  0x2a   : > { %s1013_s27 = scalar_lea.vmem (!%p938_p3), [#allocation2], %s554_s6 }
  0x2d   : > { %848 = dma.done.wait (%p971_p12), %s234_s7, 64  }
  0x2e   : > { %850 = vsyncadd (%p971_p12), %s234_s7, 4294967232 }
  0x2f   : > { %852 = dma.done.wait (%p43_p1), [#allocation6], 2048  }
  0x30   : > { %854 = vsyncadd (%p43_p1), [#allocation6], 4294965248  ;;  %v633_v0 = vld [vmem:[#allocation5 + $0x38] sm:$0xff]  ;;  %v632_v1 = vld [vmem:[#allocation5 + $0x30] sm:$0xff]  ;;  %s623_s8 = sshll.u32 %s933_s25, 3  ;;  %s557_s9 = sshll.u32 %s1009_s22, 3 }
  0x31   : > { %344 = vmatpush.bf16.msra.mxu0 %v633_v0  ;;  %v641_v2 = vld [vmem:[#allocation7 + $0x38] sm:$0xff]  ;;  %v640_v3 = vld [vmem:[#allocation7 + $0x30] sm:$0xff]  ;;  %v631_v4 = vld [vmem:[#allocation5 + $0x28] sm:$0xff]  ;;  %s452_s13 = scalar_lea.hbm %s1069_s5, %s623_s8  ;;  %s274_s29 = scalar_lea.vmem [#allocation8], %s557_s9 }
  0x32   : > { %427 = vmatpush.bf16.msra.mxu1 %v641_v2  ;;  %v639_v5 = vld [vmem:[#allocation7 + $0x28] sm:$0xff]  ;;  %v630_v6 = vld [vmem:[#allocation5 + $0x20] sm:$0xff]  ;;  %v629_v8 = vld [vmem:[#allocation5 + $0x18] sm:$0xff]  ;;  %s454_s30 = sshll.u32 %s274_s29, 4  ;;  %s456_s16 = sshll.u32 %s452_s13, 4  ;;  %s455_s30 = int_to_ptr.vmem [resolvable:$true] %s454_s30  ;;  %s457_s16 = int_to_ptr.hbm [resolvable:$true] %s456_s16 }
  0x33   : > { %v638_v7 = vld [vmem:[#allocation7 + $0x20] sm:$0xff]  ;;  %v637_v9 = vld [vmem:[#allocation7 + $0x18] sm:$0xff]  ;;  %v628_v10 = vld [vmem:[#allocation5 + $0x10] sm:$0xff]  ;;  %s442_s6 = scalar_lea.sflag [#allocation4], %s1009_s22  ;;  %s817_s25 = sshra.s32 %s457_s16, 4  ;;  %s818_s25 = int_to_ptr.hbm [resolvable:$true] %s817_s25 }
  0x34   : > { %v636_v11 = vld [vmem:[#allocation7 + $0x10] sm:$0xff]  ;;  %v627_v12 = vld [vmem:[#allocation5 + $0x8] sm:$0xff]  ;;  %v626_v13 = vld [vmem:[#allocation5] sm:$0xff]  ;;  %s819_s7 = scalar_lea.hbm %s818_s25, 8  ;;  %s823_s17 = scalar_lea.hbm %s1069_s5, 16 }
  0x35   : > { %345 = vmatpush.bf16.msra.mxu0 %v632_v1  ;;  %v275_v14 = vld [vmem:[%s1013_s27] sm:$0xf]  ;;  %v635_v15 = vld [vmem:[#allocation7 + $0x8] sm:$0xff]  ;;  %v634_v16 = vld [vmem:[#allocation7] sm:$0xff]  ;;  %p820_p1 = scmp.ne.s32.totalorder %s818_s25, %s819_s7  ;;  %p824_p12 = scmp.lt.s32.totalorder %s818_s25, %s1069_s5 }
  0x36   : > { %428 = vmatpush.bf16.msra.mxu1 %v640_v3  ;;  %v711_v17 = vld [vmem:[%s1066_s2] ss:$0 sm:$0xff]  ;;  %p825_p7 = scmp.lt.s32.totalorder %s823_s17, %s819_s7 }
  0x37   : > { %v712_v23 = vld [vmem:[%s1068_s4] ss:$0 sm:$0xff]  ;;  %p821_p3 = pnand %p820_p1, %p978_p4 }
  0x38   : > { %p826_p8 = por %p825_p7, %p824_p12 }
  0x39   : > { %346 = vmatpush.bf16.msra.mxu0 %v631_v4  ;;  %p822_p5 = pneg %p821_p3 }
  0x3a   : > { %429 = vmatpush.bf16.msra.mxu1 %v639_v5 }
  0x3b   : > { %p827_p9 = pnand %p826_p8, %p822_p5 }
  0x3d   : > { %347 = vmatpush.bf16.msra.mxu0 %v630_v6 }
  0x3e   : > { %430 = vmatpush.bf16.msra.mxu1 %v638_v7 }
  0x41   : > { %348 = vmatpush.bf16.msra.mxu0 %v629_v8 }
  0x42   : > { %431 = vmatpush.bf16.msra.mxu1 %v637_v9 }
  0x45   : > { %349 = vmatpush.bf16.msra.mxu0 %v628_v10 }
  0x46   : > { %432 = vmatpush.bf16.msra.mxu1 %v636_v11 }
  0x49   : > { %350 = vmatpush.bf16.msra.mxu0 %v627_v12 }
  0x4a   : > { %433 = vmatpush.bf16.msra.mxu1 %v635_v15 }
  0x4d   : > { %351 = vmatpush.bf16.msra.mxu0 %v626_v13 }
  0x4e   : > { %434 = vmatpush.bf16.msra.mxu1 %v634_v16 }
  0x50   : > { %352 = vmatmul.bf16.vlgmr.msra.gmra.mxu0 %v275_v14 }
  0xcd   : > { %v353_v18 = vpop.f32.mrf.mxu0 }
  0xce   : > { %v354_v19 = vadd.f32 %v711_v17, %v353_v18 }
  0xd0   : > { %v357_v20 = vmax.f32 %v354_v19, 0.0 }
  0xd2   : > { %v358_v21 = vpack.c.bf16 %v357_v20, %v357_v20 }
  0xd4   : > { %435 = vmatmul.bf16.vlgmr.msra.gmra.mxu1 %v358_v21 }
  0xd5   : > { %v355_v22 = vpop.f32.mrf.mxu0 }
 0x151   : > { %v436_v24 = vpop.f32.mrf.mxu1 }
 0x152   : > { %v437_v25 = vadd.f32 %v712_v23, %v436_v24 }
 0x154   : > { %440 = vst [vmem:[%s274_s29] sm:$0xff] %v437_v25 }
 0x155   : > { %830 = shalt.err (!%p827_p9)
}
 0x156   : > { %652 = dma.vmem_to_hbm [thread:$0]  (%p978_p4), %s455_s30, 128, %s457_s16, %s442_s6  }
 0x159   : > { %v438_v26 = vpop.f32.mrf.mxu1 }
 0x15a PF: > { %s468_s22 = sand.u32 1, %s861_s18   ;;  %p1076_p10 = scmp.ge.s32.totalorder %s873_s21, 2 }
 0x15b   : > { %s469_s10 = scalar_lea.sflag [#allocation4], %s468_s22 }
 0x15c   : > { %p666_p13 = pnand %p1076_p10, %p982_p6 }
 0x15e   : > { %p667_p11 = pneg %p666_p13 }
 0x160   : > { %856 = dma.done.wait (%p667_p11), %s469_s10, 128  }
 0x161   : > { %858 = vsyncadd (%p667_p11), %s469_s10, 4294967168  ;;  %p19_p0 = scmp.ge.s32.totalorder %s952_s12, 4   ;;  %s1077_s18 = smov %s865_s19 }
 0x162   : > { %s1078_s19 = smov %s869_s20  ;;  %s1079_s20 = smov %s963_s15 }
 0x163   : > { %s1080_s21 = smov %s952_s12  ;;  %21 = sbr.rel (!%p19_p0) target bundleno = 6 (0x6), region = 93 }
 0x168   :  { %475 = vsyncpa [#allocation3], 1 }
 0x169   :  { %477 = vsyncpa [#allocation3 + $0x1], 1 }
 0x16a   :  { %478 = vsyncpa [#allocation6], 1 }
 0x16b   :  { %479 = vsyncpa [#allocation4], 1 }
 0x16c   :  { %481 = vsyncpa [#allocation4 + $0x1], 1 }

</bundles_post_ra>
